<compile_context>
chip_gen: v7x
topology: tpu7x:2x2x1
jax: 0.10.0
libtpu: 0.0.40
codegen_flags: <defaults>
</compile_context>

<pallas_src>
import functools

import jax
import jax.numpy as jnp
from jax import lax
from jax.experimental import pallas as pl
from jax.experimental.pallas import tpu as pltpu


# ----------------------------------------------------------------------------
# Pallas kernel
# ----------------------------------------------------------------------------
def path_gnn_kernel(offs, dims, x_ref, idx_ref, dstrow_ref, slab_ref, out_ref):
    f32 = jnp.float32
    n, e2 = dims["n"], dims["e2"]
    fin, c, emb, p = dims["fin"], dims["c"], dims["emb"], dims["p"]

    def w(name, rows, cols):
        o = offs[name]                                # static python int
        return slab_ref[o:o + rows, 0:cols]

    # Incidence matrices built in-register from int32 index vectors (no [E2,N] DMA).
    col = lax.broadcasted_iota(jnp.int32, (e2, n), 1)            # node index per lane
    src2 = idx_ref[:, 0:1]                                       # [E2, 1]
    dst2 = idx_ref[:, 1:2]                                       # [E2, 1]
    s2 = (col == src2).astype(f32)                               # [E2, N] source one-hot
    t_mask = col == dst2                                         # [E2, N] bool
    t2 = t_mask.astype(f32)                                      # [E2, N] target one-hot
    row = lax.broadcasted_iota(jnp.int32, (n, e2), 0)            # node index per sublane
    t2t = (row == dstrow_ref[...]).astype(f32)                   # [N, E2] transposed target

    def gat_layer(y, wcat, bcat, att_row, cb):
        # fused lin_l / lin_r: one matmul, halves sliced in lanes
        xlr = jnp.dot(y, wcat, preferred_element_type=f32) + bcat      # [N, 2C]
        xl = xlr[:, :c]
        xr = xlr[:, c:]

        xls = jnp.dot(s2, xl, preferred_element_type=f32)              # x_l[src]  [E2, C]
        xrd = jnp.dot(t2, xr, preferred_element_type=f32)              # x_r[dst]  [E2, C]

        z = xls + xrd
        z = jnp.where(z > 0, z, 0.2 * z)                               # LeakyReLU(0.2)
        # attention score: VPU multiply + XLU lane reduce (keeps MXU chain short)
        alpha = jnp.sum(z * att_row, axis=-1, keepdims=True)           # [E2, 1]

        # softmax grouped by target node, normalized at the NODE level
        neg = jnp.float32(-1e30)
        node_max = jnp.max(jnp.where(t_mask, alpha, neg), axis=0,
                           keepdims=True)                              # [1, N]
        edge_max = jnp.sum(t2 * node_max, axis=1, keepdims=True)       # [E2, 1] (one-hot gather)
        ea = jnp.exp(alpha - edge_max)                                 # [E2, 1]
        node_sum = jnp.dot(t2t, ea, preferred_element_type=f32)        # [N, 1]

        msg = ea * xls                                                 # [E2, C]
        out = (jnp.dot(t2t, msg, preferred_element_type=f32)           # scatter-add [N, C]
               * (1.0 / node_sum) + cb)                                # exact reciprocal
        return jnp.maximum(out, 0.0)                                   # .relu()

    y = x_ref[...]
    y = gat_layer(y, w("wcat1", fin, 2 * c), w("bcat1", 1, 2 * c),
                  w("att1", 1, c), w("cb1", 1, c))
    y = gat_layer(y, w("wcat2", c, 2 * c), w("bcat2", 1, 2 * c),
                  w("att2", 1, c), w("cb2", 1, c))

    # Folded path pooling:  path_emb = 0.5 * path_masks @ (S0+T0) @ y = pm_nodes @ y
    path_emb = jnp.dot(w("pm", p, n), y, preferred_element_type=f32)   # [P, C]
    out_ref[...] = (jnp.dot(path_emb, w("wo", c, emb),
                            preferred_element_type=f32) + w("bo", 1, emb))


# ----------------------------------------------------------------------------
# One-time setup: packing of structure + weights (hoisted off the per-call path)
# ----------------------------------------------------------------------------
def _pack_slab(named_tensors, lane_width):
    """Stack 2-D tensors into one f32 slab; each block padded to 8 rows / lane_width."""
    offs, blocks, row = {}, [], 0
    for name, t in named_tensors:
        t = jnp.asarray(t, jnp.float32)
        r, cc = t.shape
        r_pad = ((r + 7) // 8) * 8
        blk = jnp.zeros((r_pad, lane_width), jnp.float32).at[:r, :cc].set(t)
        blocks.append(blk)
        offs[name] = row
        row += r_pad
    return jnp.concatenate(blocks, axis=0), offs


def prepare_path_gnn(edge_index, path_masks, params, n_nodes):
    (wl1, bl1, wr1, br1, att1, cb1,
     wl2, bl2, wr2, br2, att2, cb2, wo, bo) = params
    f32 = jnp.float32

    src = jnp.asarray(edge_index[0], jnp.int32)
    dst = jnp.asarray(edge_index[1], jnp.int32)
    # PyG GATv2Conv: remove_self_loops then add_self_loops; input must be loop-free.
    assert not bool(jnp.any(src == dst)), "edge_index must not contain self-loops"

    loops = jnp.arange(n_nodes, dtype=jnp.int32)
    src2 = jnp.concatenate([src, loops])
    dst2 = jnp.concatenate([dst, loops])
    idx_col = jnp.stack([src2, dst2], axis=1)          # [E2, 2] i32
    dst_row = dst2[None, :]                            # [1, E2] i32

    # Folded path pooling matrix (structure only, built once):
    #   pm_nodes[p, n] = 0.5 * sum_e path_masks[p, e] * ([src[e]==n] + [dst[e]==n])
    pm = jnp.asarray(path_masks, f32)
    n_paths = pm.shape[0]
    pm_nodes = jnp.zeros((n_paths, n_nodes), f32)
    pm_nodes = pm_nodes.at[:, src].add(pm)
    pm_nodes = pm_nodes.at[:, dst].add(pm)
    pm_nodes = 0.5 * pm_nodes

    c, emb = wo.shape
    fin = wl1.shape[0]
    slab, offs = _pack_slab([
        ("wcat1", jnp.concatenate([wl1, wr1], axis=1)),
        ("bcat1", jnp.concatenate([bl1, br1], axis=1)),
        ("att1", att1.reshape(1, -1)),
        ("cb1", cb1),
        ("wcat2", jnp.concatenate([wl2, wr2], axis=1)),
        ("bcat2", jnp.concatenate([bl2, br2], axis=1)),
        ("att2", att2.reshape(1, -1)),
        ("cb2", cb2),
        ("wo", wo),
        ("bo", bo),
        ("pm", pm_nodes),
    ], lane_width=2 * c)

    dims = dict(n=int(n_nodes), e2=int(src2.shape[0]), fin=int(fin),
                c=int(c), emb=int(emb), p=int(n_paths))
    return idx_col, dst_row, slab, offs, dims


def _cost_estimate(dims, batch, in_bytes, out_bytes):
    n, e2, fin, c, emb, p = (dims[k] for k in ("n", "e2", "fin", "c", "emb", "p"))
    per_graph = (2 * n * fin * 2 * c + 2 * n * c * 2 * c      # lin_l/lin_r (both layers)
                 + 2 * 2 * (2 * e2 * n * c)                   # xls/xrd gathers
                 + 2 * (2 * n * e2 * (c + 1))                 # scatter-add + node_sum
                 + 2 * p * n * c + 2 * p * c * emb)           # pooling + readout
    return pl.CostEstimate(flops=batch * per_graph,
                           transcendentals=batch * 2 * e2,
                           bytes_accessed=in_bytes + out_bytes)


def make_path_gnn(edge_index, path_masks, params, n_nodes):
    """Build a jitted forward. Structure/weight packing happens once, here."""
    idx_col, dst_row, slab, offs, dims = prepare_path_gnn(
        edge_index, path_masks, params, n_nodes)
    kernel = functools.partial(path_gnn_kernel, offs, dims)
    n, fin, e2, p, emb = dims["n"], dims["fin"], dims["e2"], dims["p"], dims["emb"]

    @jax.jit
    def forward(x):
        squeeze = x.ndim == 2
        xb = (x[None] if squeeze else x).astype(jnp.float32)   # [B, N, F]
        batch = xb.shape[0]

        in_bytes = xb.size * 4 + idx_col.size * 4 + dst_row.size * 4 + slab.size * 4
        out_bytes = batch * p * emb * 4

        out = pl.pallas_call(
            kernel,
            out_shape=jax.ShapeDtypeStruct((batch, p, emb), jnp.float32),
            grid=(batch,),
            in_specs=[
                pl.BlockSpec((None, n, fin), lambda b: (b, 0, 0)),   # per-graph features
                pl.BlockSpec((e2, 2), lambda b: (0, 0)),             # edge indices (shared)
                pl.BlockSpec((1, e2), lambda b: (0, 0)),             # dst row (shared)
                pl.BlockSpec(slab.shape, lambda b: (0, 0)),          # weight/pm slab (shared)
            ],
            out_specs=pl.BlockSpec((None, p, emb), lambda b: (b, 0, 0)),
            compiler_params=pltpu.CompilerParams(
                dimension_semantics=("parallel",)),                  # shards batch on v7x 2TC
            cost_estimate=_cost_estimate(dims, batch, in_bytes, out_bytes),
        )(xb, idx_col, dst_row, slab)

        out = out.reshape(batch, p * emb)
        return out[0] if squeeze else out                            # .flatten() per graph

    return forward


# ----------------------------------------------------------------------------
# Pure-JAX reference (segment ops) for correctness check
# ----------------------------------------------------------------------------
def _ref_forward(x, edge_index, path_masks, params):
    (wl1, bl1, wr1, br1, att1, cb1,
     wl2, bl2, wr2, br2, att2, cb2, wo, bo) = params
    n = x.shape[0]
    src, dst = edge_index[0], edge_index[1]
    loops = jnp.arange(n, dtype=edge_index.dtype)
    src2 = jnp.concatenate([src, loops])
    dst2 = jnp.concatenate([dst, loops])

    def gat(y, wl, bl, wr, br, att, cb):
        xl = y @ wl + bl
        xr = y @ wr + br
        z = xl[src2] + xr[dst2]
        z = jnp.where(z > 0, z, 0.2 * z)
        a = (z @ att)[:, 0]
        m = jax.ops.segment_max(a, dst2, num_segments=n)
        ea = jnp.exp(a - m[dst2])
        s = jax.ops.segment_sum(ea, dst2, num_segments=n)
        an = ea / s[dst2]
        out = jax.ops.segment_sum(an[:, None] * xl[src2], dst2, num_segments=n) + cb
        return jnp.maximum(out, 0.0)

    y = gat(x, wl1, bl1, wr1, br1, att1, cb1)
    y = gat(y, wl2, bl2, wr2, br2, att2, cb2)
    edge_emb = 0.5 * (y[src] + y[dst])
    path_emb = path_masks @ edge_emb
    return (path_emb @ wo + bo).reshape(-1)


# ----------------------------------------------------------------------------
def init_params(key, in_dim, emb):
    ks = jax.random.split(key, 16)
    def lin(k, fi, fo, scale):
        return jax.random.normal(k, (fi, fo), jnp.float32) * scale
    p = []
    # layer 1
    p += [lin(ks[0], in_dim, emb, 0.3), jnp.zeros((1, emb), jnp.float32),
          lin(ks[1], in_dim, emb, 0.3), jnp.zeros((1, emb), jnp.float32),
          jax.random.normal(ks[2], (emb, 1), jnp.float32) * 0.3,
          jax.random.normal(ks[3], (1, emb), jnp.float32) * 0.1]
    # layer 2
    p += [lin(ks[4], emb, emb, 0.15), jnp.zeros((1, emb), jnp.float32),
          lin(ks[5], emb, emb, 0.15), jnp.zeros((1, emb), jnp.float32),
          jax.random.normal(ks[6], (emb, 1), jnp.float32) * 0.3,
          jax.random.normal(ks[7], (1, emb), jnp.float32) * 0.1]
    # readout
    p += [lin(ks[8], emb, emb, 0.15),
          jax.random.normal(ks[9], (1, emb), jnp.float32) * 0.1]
    return tuple(p)


if __name__ == "__main__":
    key = jax.random.PRNGKey(0)
    N, F, EMB, P, B = 8, 4, 32, 4, 2                 # nodes, in_dim, emb_dim, paths, batch

    kx, kp, km = jax.random.split(key, 3)
    xb = jax.random.normal(kx, (B, N, F), jnp.float32)   # batch of node-feature sets

    # bidirectional ring graph (no self loops): E = 16 edges
    srcs = list(range(N)) + list(range(N))
    dsts = [(i + 1) % N for i in range(N)] + [(i - 1) % N for i in range(N)]
    edge_index = jnp.array([srcs, dsts], dtype=jnp.int32)          # [2, E]
    E = edge_index.shape[1]
    path_masks = (jax.random.uniform(km, (P, E)) > 0.5).astype(jnp.float32)  # [P, E]

    params = init_params(kp, F, EMB)

    forward = make_path_gnn(edge_index, path_masks, params, N)

    out_b = jax.block_until_ready(forward(xb))        # batched API   [B, P*EMB]
    out_1 = jax.block_until_ready(forward(xb[0]))     # original API  [P*EMB]

    assert out_b.shape == (B, P * EMB)
    assert out_1.shape == (P * EMB,)

    for b in range(B):
        ref = _ref_forward(xb[b], edge_index, path_masks, params)
        assert jnp.allclose(out_b[b], ref, rtol=1e-3, atol=1e-3), f"batch {b} mismatch"
    ref0 = _ref_forward(xb[0], edge_index, path_masks, params)
    assert jnp.allclose(out_1, ref0, rtol=1e-3, atol=1e-3), "single-graph mismatch"

    print("KERNEL_OK")
</pallas_src>

<mosaic_0001>
module attributes {stable_mosaic.version = 11 : i64} {
  func.func @path_gnn_kernel(%arg0: i32, %arg1: memref<1x8x4xf32, #tpu.memory_space<vmem>>, %arg2: memref<24x2xi32, #tpu.memory_space<vmem>>, %arg3: memref<1x24xi32, #tpu.memory_space<vmem>>, %arg4: memref<136x64xf32, #tpu.memory_space<vmem>>, %arg5: memref<1x4x32xf32, #tpu.memory_space<vmem>>) attributes {dimension_semantics = [#tpu.dimension_semantics<parallel>], iteration_bounds = array<i64: 2>, scalar_prefetch = 0 : i64, scratch_operands = 0 : i64, tpu.core_type = #tpu.core_type<tc>, window_params = [{transform_indices = @transform_0, window_bounds = array<i64: 1, 8, 4>}, {pipeline_mode = #tpu.pipeline_mode<synchronous>, transform_indices = @transform_1, window_bounds = array<i64: 24, 2>}, {pipeline_mode = #tpu.pipeline_mode<synchronous>, transform_indices = @transform_2, window_bounds = array<i64: 1, 24>}, {pipeline_mode = #tpu.pipeline_mode<synchronous>, transform_indices = @transform_3, window_bounds = array<i64: 136, 64>}, {transform_indices = @transform_4, window_bounds = array<i64: 1, 4, 32>}]} {
    %0 = tpu.iota {dimensions = array<i32: 1>} : vector<24x8xi32>
    %c0 = arith.constant 0 : index
    %c0_0 = arith.constant 0 : index
    %1 = vector.load %arg2[%c0, %c0_0] : memref<24x2xi32, #tpu.memory_space<vmem>>, vector<24x1xi32>
    %c0_1 = arith.constant 0 : index
    %c1 = arith.constant 1 : index
    %2 = vector.load %arg2[%c0_1, %c1] : memref<24x2xi32, #tpu.memory_space<vmem>>, vector<24x1xi32>
    %3 = vector.broadcast %1 : vector<24x1xi32> to vector<24x8xi32>
    %4 = arith.cmpi eq, %0, %3 : vector<24x8xi32>
    %5 = arith.extui %4 : vector<24x8xi1> to vector<24x8xi32>
    %6 = arith.sitofp %5 : vector<24x8xi32> to vector<24x8xf32>
    %7 = vector.broadcast %2 : vector<24x1xi32> to vector<24x8xi32>
    %8 = arith.cmpi eq, %0, %7 : vector<24x8xi32>
    %9 = arith.extui %8 : vector<24x8xi1> to vector<24x8xi32>
    %10 = arith.sitofp %9 : vector<24x8xi32> to vector<24x8xf32>
    %11 = tpu.iota {dimensions = array<i32: 0>} : vector<8x24xi32>
    %c0_2 = arith.constant 0 : index
    %c0_3 = arith.constant 0 : index
    %12 = vector.load %arg3[%c0_2, %c0_3] : memref<1x24xi32, #tpu.memory_space<vmem>>, vector<1x24xi32>
    %13 = vector.broadcast %12 : vector<1x24xi32> to vector<8x24xi32>
    %14 = arith.cmpi eq, %11, %13 : vector<8x24xi32>
    %15 = arith.extui %14 : vector<8x24xi1> to vector<8x24xi32>
    %16 = arith.sitofp %15 : vector<8x24xi32> to vector<8x24xf32>
    %c0_4 = arith.constant 0 : index
    %c0_5 = arith.constant 0 : index
    %c0_6 = arith.constant 0 : index
    %17 = vector.load %arg1[%c0_4, %c0_5, %c0_6] : memref<1x8x4xf32, #tpu.memory_space<vmem>>, vector<1x8x4xf32>
    %18 = vector.shape_cast %17 : vector<1x8x4xf32> to vector<8x4xf32>
    %c0_7 = arith.constant 0 : index
    %c0_8 = arith.constant 0 : index
    %19 = vector.load %arg4[%c0_7, %c0_8] : memref<136x64xf32, #tpu.memory_space<vmem>>, vector<4x64xf32>
    %c8 = arith.constant 8 : index
    %c0_9 = arith.constant 0 : index
    %20 = vector.load %arg4[%c8, %c0_9] : memref<136x64xf32, #tpu.memory_space<vmem>>, vector<1x64xf32>
    %c16 = arith.constant 16 : index
    %c0_10 = arith.constant 0 : index
    %21 = vector.load %arg4[%c16, %c0_10] : memref<136x64xf32, #tpu.memory_space<vmem>>, vector<1x32xf32>
    %c24 = arith.constant 24 : index
    %c0_11 = arith.constant 0 : index
    %22 = vector.load %arg4[%c24, %c0_11] : memref<136x64xf32, #tpu.memory_space<vmem>>, vector<1x32xf32>
    %cst = arith.constant dense<0.000000e+00> : vector<8x64xf32>
    %23 = tpu.matmul %18, %19, %cst {dimension_numbers = #tpu.dot_dimension_numbers<[1], [0], [0], [1], [0, 0, 1, 1], [], []>} : vector<8x4xf32>, vector<4x64xf32>, vector<8x64xf32> -> vector<8x64xf32>
    %24 = vector.broadcast %20 : vector<1x64xf32> to vector<8x64xf32>
    %25 = arith.addf %23, %24 : vector<8x64xf32>
    %26 = vector.extract_strided_slice %25 {offsets = [0, 0], sizes = [8, 32], strides = [1, 1]} : vector<8x64xf32> to vector<8x32xf32>
    %27 = vector.extract_strided_slice %25 {offsets = [0, 32], sizes = [8, 32], strides = [1, 1]} : vector<8x64xf32> to vector<8x32xf32>
    %cst_12 = arith.constant dense<0.000000e+00> : vector<24x32xf32>
    %28 = tpu.matmul %6, %26, %cst_12 {dimension_numbers = #tpu.dot_dimension_numbers<[1], [0], [0], [1], [0, 0, 1, 1], [], []>} : vector<24x8xf32>, vector<8x32xf32>, vector<24x32xf32> -> vector<24x32xf32>
    %cst_13 = arith.constant dense<0.000000e+00> : vector<24x32xf32>
    %29 = tpu.matmul %10, %27, %cst_13 {dimension_numbers = #tpu.dot_dimension_numbers<[1], [0], [0], [1], [0, 0, 1, 1], [], []>} : vector<24x8xf32>, vector<8x32xf32>, vector<24x32xf32> -> vector<24x32xf32>
    %30 = arith.addf %28, %29 : vector<24x32xf32>
    %cst_14 = arith.constant 0.000000e+00 : f32
    %31 = vector.broadcast %cst_14 : f32 to vector<24x32xf32>
    %32 = arith.cmpf ogt, %30, %31 : vector<24x32xf32>
    %cst_15 = arith.constant 2.000000e-01 : f32
    %33 = vector.broadcast %cst_15 : f32 to vector<24x32xf32>
    %34 = arith.mulf %33, %30 : vector<24x32xf32>
    %35 = arith.select %32, %30, %34 : vector<24x32xi1>, vector<24x32xf32>
    %36 = vector.broadcast %21 : vector<1x32xf32> to vector<24x32xf32>
    %37 = arith.mulf %35, %36 : vector<24x32xf32>
    %cst_16 = arith.constant dense<0.000000e+00> : vector<24xf32>
    %38 = vector.multi_reduction <add>, %37, %cst_16 [1] : vector<24x32xf32> to vector<24xf32>
    %39 = vector.shape_cast %38 : vector<24xf32> to vector<24x1xf32>
    %cst_17 = arith.constant -1.000000e+30 : f32
    %40 = vector.shape_cast %39 : vector<24x1xf32> to vector<24x1xf32>
    %41 = vector.broadcast %40 : vector<24x1xf32> to vector<24x8xf32>
    %42 = vector.broadcast %cst_17 : f32 to vector<24x8xf32>
    %43 = arith.select %8, %41, %42 : vector<24x8xi1>, vector<24x8xf32>
    %cst_18 = arith.constant dense<0xFF800000> : vector<8xf32>
    %44 = vector.multi_reduction <maximumf>, %43, %cst_18 [0] : vector<24x8xf32> to vector<8xf32>
    %45 = vector.shape_cast %44 : vector<8xf32> to vector<1x8xf32>
    %46 = vector.broadcast %45 : vector<1x8xf32> to vector<24x8xf32>
    %47 = arith.mulf %10, %46 : vector<24x8xf32>
    %cst_19 = arith.constant dense<0.000000e+00> : vector<24xf32>
    %48 = vector.multi_reduction <add>, %47, %cst_19 [1] : vector<24x8xf32> to vector<24xf32>
    %49 = vector.shape_cast %48 : vector<24xf32> to vector<24x1xf32>
    %50 = arith.subf %39, %49 : vector<24x1xf32>
    %51 = math.exp %50 : vector<24x1xf32>
    %cst_20 = arith.constant dense<0.000000e+00> : vector<8x1xf32>
    %52 = tpu.matmul %16, %51, %cst_20 {dimension_numbers = #tpu.dot_dimension_numbers<[1], [0], [0], [1], [0, 0, 1, 1], [], []>} : vector<8x24xf32>, vector<24x1xf32>, vector<8x1xf32> -> vector<8x1xf32>
    %53 = vector.broadcast %51 : vector<24x1xf32> to vector<24x32xf32>
    %54 = arith.mulf %53, %28 : vector<24x32xf32>
    %cst_21 = arith.constant dense<0.000000e+00> : vector<8x32xf32>
    %55 = tpu.matmul %16, %54, %cst_21 {dimension_numbers = #tpu.dot_dimension_numbers<[1], [0], [0], [1], [0, 0, 1, 1], [], []>} : vector<8x24xf32>, vector<24x32xf32>, vector<8x32xf32> -> vector<8x32xf32>
    %cst_22 = arith.constant 1.000000e+00 : f32
    %56 = vector.broadcast %cst_22 : f32 to vector<8x1xf32>
    %57 = arith.divf %56, %52 : vector<8x1xf32>
    %58 = vector.broadcast %57 : vector<8x1xf32> to vector<8x32xf32>
    %59 = arith.mulf %55, %58 : vector<8x32xf32>
    %60 = vector.broadcast %22 : vector<1x32xf32> to vector<8x32xf32>
    %61 = arith.addf %59, %60 : vector<8x32xf32>
    %cst_23 = arith.constant 0.000000e+00 : f32
    %62 = vector.broadcast %cst_23 : f32 to vector<8x32xf32>
    %63 = arith.maximumf %61, %62 : vector<8x32xf32>
    %c32 = arith.constant 32 : index
    %c0_24 = arith.constant 0 : index
    %64 = vector.load %arg4[%c32, %c0_24] : memref<136x64xf32, #tpu.memory_space<vmem>>, vector<32x64xf32>
    %c64 = arith.constant 64 : index
    %c0_25 = arith.constant 0 : index
    %65 = vector.load %arg4[%c64, %c0_25] : memref<136x64xf32, #tpu.memory_space<vmem>>, vector<1x64xf32>
    %c72 = arith.constant 72 : index
    %c0_26 = arith.constant 0 : index
    %66 = vector.load %arg4[%c72, %c0_26] : memref<136x64xf32, #tpu.memory_space<vmem>>, vector<1x32xf32>
    %c80 = arith.constant 80 : index
    %c0_27 = arith.constant 0 : index
    %67 = vector.load %arg4[%c80, %c0_27] : memref<136x64xf32, #tpu.memory_space<vmem>>, vector<1x32xf32>
    %cst_28 = arith.constant dense<0.000000e+00> : vector<8x64xf32>
    %68 = tpu.matmul %63, %64, %cst_28 {dimension_numbers = #tpu.dot_dimension_numbers<[1], [0], [0], [1], [0, 0, 1, 1], [], []>} : vector<8x32xf32>, vector<32x64xf32>, vector<8x64xf32> -> vector<8x64xf32>
    %69 = vector.broadcast %65 : vector<1x64xf32> to vector<8x64xf32>
    %70 = arith.addf %68, %69 : vector<8x64xf32>
    %71 = vector.extract_strided_slice %70 {offsets = [0, 0], sizes = [8, 32], strides = [1, 1]} : vector<8x64xf32> to vector<8x32xf32>
    %72 = vector.extract_strided_slice %70 {offsets = [0, 32], sizes = [8, 32], strides = [1, 1]} : vector<8x64xf32> to vector<8x32xf32>
    %cst_29 = arith.constant dense<0.000000e+00> : vector<24x32xf32>
    %73 = tpu.matmul %6, %71, %cst_29 {dimension_numbers = #tpu.dot_dimension_numbers<[1], [0], [0], [1], [0, 0, 1, 1], [], []>} : vector<24x8xf32>, vector<8x32xf32>, vector<24x32xf32> -> vector<24x32xf32>
    %cst_30 = arith.constant dense<0.000000e+00> : vector<24x32xf32>
    %74 = tpu.matmul %10, %72, %cst_30 {dimension_numbers = #tpu.dot_dimension_numbers<[1], [0], [0], [1], [0, 0, 1, 1], [], []>} : vector<24x8xf32>, vector<8x32xf32>, vector<24x32xf32> -> vector<24x32xf32>
    %75 = arith.addf %73, %74 : vector<24x32xf32>
    %cst_31 = arith.constant 0.000000e+00 : f32
    %76 = vector.broadcast %cst_31 : f32 to vector<24x32xf32>
    %77 = arith.cmpf ogt, %75, %76 : vector<24x32xf32>
    %cst_32 = arith.constant 2.000000e-01 : f32
    %78 = vector.broadcast %cst_32 : f32 to vector<24x32xf32>
    %79 = arith.mulf %78, %75 : vector<24x32xf32>
    %80 = arith.select %77, %75, %79 : vector<24x32xi1>, vector<24x32xf32>
    %81 = vector.broadcast %66 : vector<1x32xf32> to vector<24x32xf32>
    %82 = arith.mulf %80, %81 : vector<24x32xf32>
    %cst_33 = arith.constant dense<0.000000e+00> : vector<24xf32>
    %83 = vector.multi_reduction <add>, %82, %cst_33 [1] : vector<24x32xf32> to vector<24xf32>
    %84 = vector.shape_cast %83 : vector<24xf32> to vector<24x1xf32>
    %cst_34 = arith.constant -1.000000e+30 : f32
    %85 = vector.shape_cast %84 : vector<24x1xf32> to vector<24x1xf32>
    %86 = vector.broadcast %85 : vector<24x1xf32> to vector<24x8xf32>
    %87 = vector.broadcast %cst_34 : f32 to vector<24x8xf32>
    %88 = arith.select %8, %86, %87 : vector<24x8xi1>, vector<24x8xf32>
    %cst_35 = arith.constant dense<0xFF800000> : vector<8xf32>
    %89 = vector.multi_reduction <maximumf>, %88, %cst_35 [0] : vector<24x8xf32> to vector<8xf32>
    %90 = vector.shape_cast %89 : vector<8xf32> to vector<1x8xf32>
    %91 = vector.broadcast %90 : vector<1x8xf32> to vector<24x8xf32>
    %92 = arith.mulf %10, %91 : vector<24x8xf32>
    %cst_36 = arith.constant dense<0.000000e+00> : vector<24xf32>
    %93 = vector.multi_reduction <add>, %92, %cst_36 [1] : vector<24x8xf32> to vector<24xf32>
    %94 = vector.shape_cast %93 : vector<24xf32> to vector<24x1xf32>
    %95 = arith.subf %84, %94 : vector<24x1xf32>
    %96 = math.exp %95 : vector<24x1xf32>
    %cst_37 = arith.constant dense<0.000000e+00> : vector<8x1xf32>
    %97 = tpu.matmul %16, %96, %cst_37 {dimension_numbers = #tpu.dot_dimension_numbers<[1], [0], [0], [1], [0, 0, 1, 1], [], []>} : vector<8x24xf32>, vector<24x1xf32>, vector<8x1xf32> -> vector<8x1xf32>
    %98 = vector.broadcast %96 : vector<24x1xf32> to vector<24x32xf32>
    %99 = arith.mulf %98, %73 : vector<24x32xf32>
    %cst_38 = arith.constant dense<0.000000e+00> : vector<8x32xf32>
    %100 = tpu.matmul %16, %99, %cst_38 {dimension_numbers = #tpu.dot_dimension_numbers<[1], [0], [0], [1], [0, 0, 1, 1], [], []>} : vector<8x24xf32>, vector<24x32xf32>, vector<8x32xf32> -> vector<8x32xf32>
    %cst_39 = arith.constant 1.000000e+00 : f32
    %101 = vector.broadcast %cst_39 : f32 to vector<8x1xf32>
    %102 = arith.divf %101, %97 : vector<8x1xf32>
    %103 = vector.broadcast %102 : vector<8x1xf32> to vector<8x32xf32>
    %104 = arith.mulf %100, %103 : vector<8x32xf32>
    %105 = vector.broadcast %67 : vector<1x32xf32> to vector<8x32xf32>
    %106 = arith.addf %104, %105 : vector<8x32xf32>
    %cst_40 = arith.constant 0.000000e+00 : f32
    %107 = vector.broadcast %cst_40 : f32 to vector<8x32xf32>
    %108 = arith.maximumf %106, %107 : vector<8x32xf32>
    %c128 = arith.constant 128 : index
    %c0_41 = arith.constant 0 : index
    %109 = vector.load %arg4[%c128, %c0_41] : memref<136x64xf32, #tpu.memory_space<vmem>>, vector<4x8xf32>
    %cst_42 = arith.constant dense<0.000000e+00> : vector<4x32xf32>
    %110 = tpu.matmul %109, %108, %cst_42 {dimension_numbers = #tpu.dot_dimension_numbers<[1], [0], [0], [1], [0, 0, 1, 1], [], []>} : vector<4x8xf32>, vector<8x32xf32>, vector<4x32xf32> -> vector<4x32xf32>
    %c88 = arith.constant 88 : index
    %c0_43 = arith.constant 0 : index
    %111 = vector.load %arg4[%c88, %c0_43] : memref<136x64xf32, #tpu.memory_space<vmem>>, vector<32x32xf32>
    %cst_44 = arith.constant dense<0.000000e+00> : vector<4x32xf32>
    %112 = tpu.matmul %110, %111, %cst_44 {dimension_numbers = #tpu.dot_dimension_numbers<[1], [0], [0], [1], [0, 0, 1, 1], [], []>} : vector<4x32xf32>, vector<32x32xf32>, vector<4x32xf32> -> vector<4x32xf32>
    %c120 = arith.constant 120 : index
    %c0_45 = arith.constant 0 : index
    %113 = vector.load %arg4[%c120, %c0_45] : memref<136x64xf32, #tpu.memory_space<vmem>>, vector<1x32xf32>
    %114 = vector.broadcast %113 : vector<1x32xf32> to vector<4x32xf32>
    %115 = arith.addf %112, %114 : vector<4x32xf32>
    %c0_46 = arith.constant 0 : index
    %c0_47 = arith.constant 0 : index
    %c0_48 = arith.constant 0 : index
    %116 = vector.load %arg5[%c0_46, %c0_47, %c0_48] : memref<1x4x32xf32, #tpu.memory_space<vmem>>, vector<1x4x32xf32>
    %117 = vector.shape_cast %116 : vector<1x4x32xf32> to vector<4x32xf32>
    %118 = vector.shape_cast %115 : vector<4x32xf32> to vector<1x4x32xf32>
    tpu.vector_store %arg5[%c0_46, %c0_47, %c0_48], %118 {strides = array<i32>} : memref<1x4x32xf32, #tpu.memory_space<vmem>>, vector<1x4x32xf32>,
    return
  }
  func.func @transform_0(%arg0: i32) -> (i32, i32, i32) {
    %c0_i32 = arith.constant 0 : i32
    %c0_i32_0 = arith.constant 0 : i32
    %c0_i32_1 = arith.constant 0 : i32
    return %arg0, %c0_i32, %c0_i32_0 : i32, i32, i32
  }
  func.func @transform_1(%arg0: i32) -> (i32, i32) {
    %c0_i32 = arith.constant 0 : i32
    %c0_i32_0 = arith.constant 0 : i32
    %c0_i32_1 = arith.constant 0 : i32
    return %c0_i32, %c0_i32_0 : i32, i32
  }
  func.func @transform_2(%arg0: i32) -> (i32, i32) {
    %c0_i32 = arith.constant 0 : i32
    %c0_i32_0 = arith.constant 0 : i32
    %c0_i32_1 = arith.constant 0 : i32
    return %c0_i32, %c0_i32_0 : i32, i32
  }
  func.func @transform_3(%arg0: i32) -> (i32, i32) {
    %c0_i32 = arith.constant 0 : i32
    %c0_i32_0 = arith.constant 0 : i32
    %c0_i32_1 = arith.constant 0 : i32
    return %c0_i32, %c0_i32_0 : i32, i32
  }
  func.func @transform_4(%arg0: i32) -> (i32, i32, i32) {
    %c0_i32 = arith.constant 0 : i32
    %c0_i32_0 = arith.constant 0 : i32
    %c0_i32_1 = arith.constant 0 : i32
    return %arg0, %c0_i32, %c0_i32_0 : i32, i32, i32
  }
}

</mosaic_0001>

<bundles_post_ra>
// kernel: forward.1
= control target key start
LH: loop header
LB: loop body
LE: loop exit
PB: predicated region body
PF: predicated region fallthrough
CT: control target
= control target key end

     0   :  { %9 = vsyncpa [#allocation3], 0  ;;  %s1797_s15 = smov 0   ;;  %s2079_s0 = inlined_call_operand.vmem [shape: f32[2,8,4], index: 0, kind: input, shape index: {}]   ;;  %s2080_s1 = inlined_call_operand.vmem [shape: s32[24,2], index: 1, kind: input, shape index: {}]   ;;  %s2081_s2 = inlined_call_operand.vmem [shape: s32[1,24], index: 2, kind: input, shape index: {}]   ;;  %s2082_s3 = inlined_call_operand.hbm [shape: f32[136,64], index: 3, kind: input, shape index: {}]   ;;  %s2083_s4 = inlined_call_operand.vmem [shape: f32[2,4,32], index: 4, kind: output, shape index: {}]  }
   0x1 LB: > { %s1803_s16 = sadd.s32 4294967295, %s1761_s15   ;;  %p1447_p0 = scmp.ge.s32.totalorder %s1761_s15, 1  ;;  %s1761_s15 = sphi %s1797_s15, %s15_s15  }
   0x2   : > { %p135_p1 = scmp.lt.s32.totalorder %s1761_s15, 3  ;;  %s1763_s17 = smov [#allocation2]  }
   0x3   : > { %s153_s18 = sshll.u32 %s1763_s17, 4  ;;  %p2084_p3 = scmp.eq.s32.totalorder %s1803_s16, 0  ;;  %s154_s18 = int_to_ptr.vmem [resolvable:$true] %s153_s18 }
   0x4   : > { %p1807_p2 = pnand %p1447_p0, %p135_p1  ;;  %s1723_s23 = scalar_lea.hbm %s2082_s3, 2176 }
   0x5   : > { %p1724_p6 = scmp.ne.s32.totalorder %s2082_s3, %s1723_s23  ;;  %p1730_p10 = scmp.lt.u32.totalorder %s1723_s23, %s2082_s3 }
   0x6   : > { %s2086_s19 = scalar_select %p1807_p2, 1, 0 }
   0x7   : > { %p1678_p4 = pneg %p1807_p2 }
   0x9   : > { %p1816_p5 = pnand %p2084_p3, %p1678_p4 }
   0xb   : > { %p1725_p7 = pneg %p1816_p5 }
   0xd   : > { %p1726_p8 = pnand %p1725_p7, %p1724_p6 }
   0xf   : > { %p1727_p9 = pneg %p1726_p8 }
  0x11   : > { %p1732_p11 = pnand %p1730_p10, %p1727_p9 }
  0x13   : > { %1735 = shalt.err (!%p1732_p11)
}
  0x14   : > { %s1736_s28 = scalar_lea.vmem %s154_s18, 2176  ;;  %p1744_p1 = scmp.lt.s32.totalorder %s154_s18, %s154_s18 }
  0x15   : > { %p1737_p12 = scmp.ne.s32.totalorder %s154_s18, %s1736_s28  ;;  %p1745_p4 = scmp.lt.s32.totalorder %s1736_s28, %s1736_s28 }
  0x17   : > { %p1739_p13 = pnand %p1737_p12, %p1725_p7  ;;  %p1746_p3 = por %p1745_p4, %p1744_p1 }
  0x19   : > { %p1740_p0 = pneg %p1739_p13 }
  0x1b   : > { %p1747_p2 = pnand %p1746_p3, %p1740_p0 }
  0x1d   : > { %1750 = shalt.err (!%p1747_p2)
}
  0x1e   : > { %s1764_s29 = smov 128   ;;  %s1765_s30 = smov 8  }
  0x1f   : > { %1681 = dma.hbm_to_vmem [thread:$0]  (!%p1816_p5), %s2082_s3, 2176, %s154_s18, [#allocation3], %s1764_s29, %s1764_s29, %s1765_s30  }
  0x20   : > { %p2088_p6 = scmp.ne.s32.totalorder %s2086_s19, 0 }
  0x21   : > { %p2089_p8 = scmp.eq.s32.totalorder (!%p2088_p6), %s1803_s16, 0 }
  0x22   : > { %176 = sbr.rel (%p2088_p6) target bundleno = 2958 (0xb8e), region = 36 }
  0x29   : > { %1756 = dma.done.wait (%p2089_p8), [#allocation3], 2176   ;;  %p2090_p7 = pmov %p2089_p8 }
  0x2a   : > { %p200_p2 = scmp.lt.s32.totalorder %s1803_s16, 1  ;;  %v1766_v0 = vmov 0.0   ;;  %vm1767_vm0 = vmmov 0   ;;  %v1768_v1 = vmov 0   ;;  %vm272_vm1 = vcmask 1043456   ;;  %v210_v4 = vld [vmem:[%s2080_s1] sm:$0xff] }
  0x2b   : > { %1758 = vsyncadd (%p2090_p7), [#allocation3], 4294965120  ;;  %1538 = vmatprep.subr.mxu1 %v1766_v0  ;;  %1540 = vmatprep.mubr.msk.f32.mxu1 %vm1767_vm0, %v1766_v0  ;;  %vm268_vm2 = vcmask 31744   ;;  %v260_v2 = vld [vmem:[#allocation2] sm:$0xf]  ;;  %v211_v5 = vld [vmem:[%s2080_s1 + $0x8] sm:$0xff]  ;;  %v208_v8 = vlaneseq }
  0x2c   : > { %s2092_s16 = smov (!%p200_p2, %s1803_s16), 1  ;;  %1701 = vset.pattern.permute.xlu0 %v1768_v1  ;;  %1703 = vset.pattern.permute.xlu1 %v1768_v1  ;;  %v1769_v6 = vmov 1   ;;  %v212_v7 = vld [vmem:[%s2080_s1 + $0x10] sm:$0xff]  ;;  %v1462_v13 = vld [vmem:[#allocation2 + $0x8] ss:$0 sm:$0xff]  ;;  %vm346_vm5 = vcmask 64512  }
  0x2d   : > { %1554 = vmatprep.subr.mxu0 %v1766_v0  ;;  %1556 = vmatprep.mubr.msk.f32.mxu0 %vm1767_vm0, %v1766_v0  ;;  %s1452_s7 = sshll.u32 %s2092_s16, 3  ;;  %v1869_v10 = vand.u32 127, %v208_v8  ;;  %s1770_s19 = smov 96   ;;  %v1471_v37 = vld [vmem:[#allocation2 + $0x10] ss:$0 sm:$0xff]  ;;  %vm548_vm11 = vcmask 261120  }
  0x2e   : > { %s203_s10 = scalar_lea.vmem %s2079_s0, %s1452_s7  ;;  %1539 = vmatpush3.msk.msra.mxu1 %vm272_vm1, %v260_v2  ;;  %214 = vperm.xlu0 %1701, %v210_v4   ;;  %vm593_vm15 = vcmask 195584   ;;  %s1453_s22 = sshll.u32 %s2092_s16, 2 }
  0x2f   : > { %v259_v3 = vld [vmem:[%s203_s10] sm:$0xff]  ;;  %217 = vperm.xlu1 %1703, %v211_v5   ;;  %1543 = vmatprep.subr.mxu1 %v1766_v0  ;;  %s207_s25 = scalar_lea.vmem %s2083_s4, %s1453_s22 }
  0x30   : > { %1541 = vmatmul.mubr.msk.f32.vlgmr.msra.gmra.mrb[0].mxu1 %vm268_vm2, %v259_v3 }
  0x31   : > { %1545 = vmatprep.mubr.msk.f32.mxu1 %vm1767_vm0, %v1766_v0 }
  0x32   : > { %1702 = vset.pattern.permute.xlu0 %v1769_v6 }
  0x33   : > { %1704 = vset.pattern.permute.xlu1 %v1769_v6  ;;  %232 = vperm.xlu0 %1702, %v210_v4  }
  0x34   : > { %235 = vperm.xlu1 %1704, %v211_v5  }
  0x37   : > { %238 = vperm.xlu0 %1702, %v212_v7  }
  0x38   : > { %1705 = vset.pattern.permute.xlu1 %v1768_v1 }
  0x39   : > { %220 = vperm.xlu1 %1705, %v212_v7  }
  0x3b   : > { %1706 = vset.pattern.permute.xlu0 %v1768_v1 }
  0xad   : > { %v215_v12 = vpop.permute.xlu0 %214 }
  0xae   : > { %v218_v9 = vpop.permute.xlu1 %217  ;;  %vm222_vm4 = vcmp.eq.s32.totalorder %v1869_v10, %v215_v12 }
  0xaf   : > { %v1877_v17 = vsel %vm222_vm4, 1.0, %v1766_v0  ;;  %vm223_vm6 = vcmp.eq.s32.totalorder %v1869_v10, %v218_v9 }
  0xb0   : > { %v1884_v19 = vsel %vm223_vm6, 1.0, %v1766_v0 }
  0xb2   : > { %v1900_v21 = vpop.permute.xlu0 %232 }
  0xb3   : > { %v1871_v11 = vpop.permute.xlu1 %235  ;;  %vm240_vm8 = vcmp.eq.s32.totalorder %v1869_v10, %v1900_v21 }
  0xb4   : > { %vm241_vm3 = vcmp.eq.s32.totalorder %v1869_v10, %v1871_v11  ;;  %v1908_v22 = vsel %vm240_vm8, 1.0, %v1766_v0 }
  0xb5   : > { %v1920_v25 = vsel %vm241_vm3, 1.0, %v1766_v0 }
  0xb6   : > { %v1912_v24 = vpop.permute.xlu0 %238 }
  0xb7   : > { %vm242_vm9 = vcmp.eq.s32.totalorder %v1869_v10, %v1912_v24 }
  0xb8   : > { %v221_v18 = vpop.permute.xlu1 %220  ;;  %v1932_v26 = vsel %vm242_vm9, 1.0, %v1766_v0 }
  0xb9   : > { %vm224_vm7 = vcmp.eq.s32.totalorder %v1869_v10, %v221_v18 }
  0xba   : > { %v1892_v20 = vsel %vm224_vm7, 1.0, %v1766_v0 }
 0x103   : > { %v342_v14 = vpop.f32.mrb[0].mxu1 }
 0x104   : > { %v343_v15 = vadd.f32 %v1462_v13, %v342_v14  ;;  %v1542_v16 = vpop.f32.mrb[1].mxu1 }
 0x106   : > { %1544 = vmatpush3.msra.mxu1 %v343_v15  ;;  %437 = vrot.lane.b32.xlu1 %v343_v15, %s1770_s19 }
 0x107   : > { %1546 = vmatmul.mubr.msk.f32.vlgmr.msra.gmra.mrb[2].mxu1 %vm346_vm5, %v1877_v17 }
 0x108   : > { %1548 = vmatprep.mubr.msk.f32.mxu1 %vm1767_vm0, %v1766_v0 }
 0x10b   : > { %1549 = vmatmul.mubr.msk.f32.gmra.mrb[4].mxu1 %vm346_vm5, %v1884_v19 }
 0x10c   : > { %1551 = vmatprep.mubr.msk.f32.mxu1 %vm1767_vm0, %v1766_v0 }
 0x10f   : > { %1552 = vmatmul.mubr.msk.f32.gmra.mrb[6].mxu1 %vm346_vm5, %v1892_v20 }
 0x110   : > { %1571 = vmatprep.mubr.msk.f32.mxu1 %vm1767_vm0, %v1766_v0 }
 0x178   : > { %v438_v23 = vpop.permute.xlu1 %437 }
 0x179   : > { %1555 = vmatpush3.msra.mxu0 %v438_v23  ;;  %v1771_v23 = vmov 0.0|0.0  }
 0x17a   : > { %1557 = vmatmul.mubr.msk.f32.vlgmr.msra.gmra.mrb[0].mxu0 %vm346_vm5, %v1908_v22  ;;  %1650 = vmatprep.subr.bf16.mxu1 %v1771_v23 }
 0x17b   : > { %1559 = vmatprep.mubr.msk.f32.mxu0 %vm1767_vm0, %v1766_v0  ;;  %1653 = vmatprep.subr.bf16.mxu0 %v1771_v23 }
 0x17e   : > { %1560 = vmatmul.mubr.msk.f32.gmra.mrb[2].mxu0 %vm346_vm5, %v1920_v25 }
 0x17f   : > { %1562 = vmatprep.mubr.msk.f32.mxu0 %vm1767_vm0, %v1766_v0 }
 0x182   : > { %1563 = vmatmul.mubr.msk.f32.gmra.mrb[4].mxu0 %vm346_vm5, %v1932_v26 }
 0x183   : > { %1580 = vmatprep.mubr.msk.f32.mxu0 %vm1767_vm0, %v1766_v0 }
 0x1da   : > { %v1938_v27 = vpop.f32.mrb[2].mxu1 }
 0x1db   : > { %v1547_v28 = vpop.f32.mrb[3].mxu1 }
 0x1de   : > { %v1940_v29 = vpop.f32.mrb[4].mxu1 }
 0x1df   : > { %v1550_v30 = vpop.f32.mrb[5].mxu1 }
 0x1e2   : > { %v1942_v31 = vpop.f32.mrb[6].mxu1 }
 0x1e3   : > { %v1553_v32 = vpop.f32.mrb[7].mxu1 }
 0x24d   : > { %v515_v33 = vpop.f32.mrb[0].mxu0 }
 0x24e   : > { %v529_v34 = vadd.f32 %v515_v33, %v1938_v27  ;;  %v1558_v35 = vpop.f32.mrb[1].mxu0 }
 0x250   : > { %vm532_vm10 = vcmp.gt.f32.partialorder %v529_v34, 0.0  ;;  %v535_v36 = vmul.f32 0.2, %v529_v34 }
 0x251   : > { %v520_v38 = vpop.f32.mrb[2].mxu0 }
 0x252   : > { %v530_v39 = vadd.f32 %v520_v38, %v1940_v29  ;;  %v1561_v40 = vpop.f32.mrb[3].mxu0  ;;  %v538_v41 = vsel %vm532_vm10, %v529_v34, %v535_v36 }
 0x253   : > { %v545_v42 = vmul.f32 %v1471_v37, %v538_v41  ;;  %v1460_v41 = vld [vmem:[%s2081_s2] ss:$0 sm:$0xff] }
 0x254   : > { %vm533_vm12 = vcmp.gt.f32.partialorder %v530_v39, 0.0  ;;  %v536_v43 = vmul.f32 0.2, %v530_v39 }
 0x255   : > { %v525_v44 = vpop.f32.mrb[4].mxu0  ;;  %v549_v45 = vsel %vm548_vm11, %v545_v42, 0.0 }
 0x256   : > { %v531_v46 = vadd.f32 %v525_v44, %v1942_v31  ;;  %550 = vadd.xlane.f32.xlu0 %v549_v45  ;;  %v1564_v47 = vpop.f32.mrb[5].mxu0  ;;  %v539_v48 = vsel %vm533_vm12, %v530_v39, %v536_v43  ;;  %v250_v39 = vshrl.u32 %v208_v8, 7 }
 0x257   : > { %v546_v49 = vmul.f32 %v1471_v37, %v539_v48 }
 0x258   : > { %vm534_vm13 = vcmp.gt.f32.partialorder %v531_v46, 0.0  ;;  %v537_v50 = vmul.f32 0.2, %v531_v46  ;;  %vm256_vm14 = vcmp.eq.s32.totalorder %v250_v39, %v1460_v41 }
 0x259   : > { %v552_v51 = vsel %vm548_vm11, %v546_v49, 0.0  ;;  %v1978_v8 = vsel %vm256_vm14, 1.0, %v1766_v0 }
 0x25a   : > { %553 = vadd.xlane.f32.xlu1 %v552_v51  ;;  %v540_v52 = vsel %vm534_vm13, %v531_v46, %v537_v50 }
 0x25b   : > { %v547_v53 = vmul.f32 %v1471_v37, %v540_v52 }
 0x25d   : > { %v555_v54 = vsel %vm548_vm11, %v547_v53, 0.0 }
 0x25e   : > { %556 = vadd.xlane.f32.xlu0 %v555_v54  ;;  %v756_v54 = vld [vmem:[#allocation2 + $0x30] sm:$0xff] }
 0x2e3   : > { %v551_v55 = vpop.xlane.xlu0 %550 }
 0x2e4   : > { %v558_v57 = vsel %vm240_vm8, %v551_v55, -1e+30 }
 0x2e5   : > { %v561_v60 = vsel %vm346_vm5, %v558_v57, -inf  ;;  %v1474_v57 = vld [vmem:[#allocation2 + $0x18] ss:$0 sm:$0xff] }
 0x2e7   : > { %v554_v56 = vpop.xlane.xlu1 %553 }
 0x2e8   : > { %v559_v58 = vsel %vm241_vm3, %v554_v56, -1e+30 }
 0x2e9   : > { %v562_v59 = vsel %vm346_vm5, %v559_v58, -inf }
 0x2ea   : > { %v564_v62 = vmax.f32 %v561_v60, %v562_v59 }
 0x2eb   : > { %v557_v61 = vpop.xlane.xlu0 %556 }
 0x2ec   : > { %v560_v63 = vsel %vm242_vm9, %v557_v61, -1e+30 }
 0x2ed   : > { %v563_v1 = vsel %vm346_vm5, %v560_v63, -inf }
 0x2ee   : > { %v565_v2 = vmax.f32 %v564_v62, %v563_v1  ;;  %v1475_v62 = vld [vmem:[#allocation2 + $0x40] ss:$0 sm:$0xff] }
 0x2f0   : > { %v566_v3 = vrot.slane %v565_v2, 4 }
 0x2f2   : > { %v567_v4 = vmax.f32 %v565_v2, %v566_v3 }
 0x2f4   : > { %v568_v5 = vrot.slane %v567_v4, 2 }
 0x2f6   : > { %v569_v6 = vmax.f32 %v567_v4, %v568_v5 }
 0x2f8   : > { %v570_v7 = vrot.slane %v569_v6, 1 }
 0x2fa   : > { %v571_v9 = vmax.f32 %v569_v6, %v570_v7 }
 0x2fc   : > { %v573_v12 = vmul.f32 %v1920_v25, %v571_v9  ;;  %v572_v13 = vmul.f32 %v1908_v22, %v571_v9  ;;  %v574_v16 = vmul.f32 %v1932_v26, %v571_v9 }
 0x2fe   : > { %v578_v14 = vsel %vm346_vm5, %v573_v12, 0.0  ;;  %v575_v15 = vsel %vm346_vm5, %v572_v13, 0.0  ;;  %v581_v18 = vsel %vm346_vm5, %v574_v16, 0.0 }
 0x2ff   : > { %579 = vadd.xlane.f32.xlu1 %v578_v14  ;;  %576 = vadd.xlane.f32.xlu0 %v575_v15  ;;  %v1483_v14 = vld [vmem:[#allocation2 + $0x48] ss:$0 sm:$0xff] }
 0x303   : > { %582 = vadd.xlane.f32.xlu0 %v581_v18 }
 0x38c   : > { %v580_v28 = vpop.xlane.xlu1 %579  ;;  %v577_v30 = vpop.xlane.xlu0 %576 }
 0x38d   : > { %v585_v32 = vsub.f32 %v554_v56, %v580_v28  ;;  %v584_v33 = vsub.f32 %v551_v55, %v577_v30  ;;  %v757_v55 = vld [vmem:[#allocation2 + $0x38] sm:$0xff] }
 0x38e   : > { %v1660_v56 = vpack.c.bf16 %v757_v55, %v756_v54 }
 0x38f   : > { %v589_v34 = vmul.f32 1.442695, %v585_v32  ;;  %v587_v35 = vmul.f32 1.442695, %v584_v33 }
 0x390   : > { %v583_v36 = vpop.xlane.xlu0 %582 }
 0x391   : > { %1707 = vpow2.f32 %v589_v34  ;;  %v586_v37 = vsub.f32 %v557_v61, %v583_v36 }
 0x392   : > { %1709 = vpow2.f32 %v587_v35 }
 0x393   : > { %v591_v38 = vmul.f32 1.442695, %v586_v37 }
 0x395   : > { %1711 = vpow2.f32 %v591_v38 }
 0x39b   : > { %v1708_v40 = vpop.eup %1707 }
 0x39c   : > { %v1710_v42 = vpop.eup %1709  ;;  %v668_v43 = vmul.f32 %v1708_v40, %v1940_v29  ;;  %v755_v29 = vld [vmem:[#allocation2 + $0x28] sm:$0xff] }
 0x39d   : > { %v1651_v44 = vpack.c.bf16 %v1708_v40, %v1710_v42  ;;  %v667_v45 = vmul.f32 %v1710_v42, %v1938_v27  ;;  %v754_v27 = vld [vmem:[#allocation2 + $0x20] sm:$0xff] }
 0x39f   : > { %1652 = vmatpush3.bf16.msra.mxu1 %v1651_v44  ;;  %v1654_v46 = vpack.c.bf16 %v668_v43, %v667_v45  ;;  %v1712_v47 = vpop.eup %1711 }
 0x3a0   : > { %1569 = vmatprep.subr.mxu1 %v1766_v0  ;;  %v669_v48 = vmul.f32 %v1712_v47, %v1942_v31  ;;  %v1657_v31 = vpack.c.bf16 %v755_v29, %v754_v27 }
 0x3a1   : > { %1655 = vmatpush3.bf16.msra.mxu0 %v1654_v46 }
 0x3a2   : > { %1578 = vmatprep.subr.mxu0 %v1766_v0 }
 0x3a3   : > { %1570 = vmatpush3.msra.mxu1 %v1712_v47 }
 0x3a4   : > { %1572 = vmatmul.mubr.msk.f32.vlgmr.msra.gmra.mrb[8].mxu1 %vm593_vm15, %v1978_v8  ;;  %1656 = vmatprep.subr.bf16.mxu1 %v1771_v23 }
 0x3a5   : > { %1579 = vmatpush3.msra.mxu0 %v669_v48  ;;  %1591 = vmatprep.mubr.msk.f32.mxu1 %vm1767_vm0, %v1766_v0 }
 0x3a6   : > { %1581 = vmatmul.mubr.msk.f32.vlgmr.msra.gmra.mrb[6].mxu0 %vm593_vm15, %v1978_v8  ;;  %1594 = vmatprep.subr.mxu0 %v1766_v0 }
 0x3a7   : > { %1596 = vmatprep.mubr.msk.f32.mxu0 %vm1767_vm0, %v1766_v0  ;;  %1658 = vmatpush3.bf16.msra.mxu1 %v1657_v31 }
 0x3a8   : > { %1659 = vmatprep.subr.bf16.mxu1 %v1771_v23 }
 0x3ab   : > { %1661 = vmatpush3.bf16.msra.mxu1 %v1660_v56 }
 0x3ac   : > { %1605 = vmatprep.subr.mxu1 %v1766_v0 }
 0x477   : > { %v663_v49 = vpop.f32.mrb[8].mxu1 }
 0x478   : > { %1713 = vrcp.f32 %v663_v49  ;;  %v1573_v50 = vpop.f32.mrb[9].mxu1 }
 0x479   : > { %v736_v51 = vpop.f32.mrb[6].mxu0 }
 0x47a   : > { %v1582_v52 = vpop.f32.mrb[7].mxu0 }
 0x482   : > { %v1714_v53 = vpop.eup %1713 }
 0x483   : > { %744 = vperm.xlu1 %1705, %v1714_v53  }
 0x502   : > { %v745_v58 = vpop.permute.xlu1 %744 }
 0x503   : > { %v747_v59 = vmul.f32 %v745_v58, %v736_v51 }
 0x505   : > { %v752_v60 = vadd.f32 %v1474_v57, %v747_v59 }
 0x507   : > { %v753_v61 = vmax.f32 %v752_v60, 0.0 }
 0x509   : > { %1592 = vmatmul.mubr.msk.f32.vlgmr.msra.gmra.mrb[10].mxu1 %vm548_vm11, %v753_v61 }
 0x50a   : > { %1607 = vmatprep.mubr.msk.f32.mxu1 %vm1767_vm0, %v1766_v0 }
 0x5dc   : > { %v834_v63 = vpop.f32.mrb[10].mxu1 }
 0x5dd   : > { %v835_v1 = vadd.f32 %v1475_v62, %v834_v63  ;;  %v1593_v2 = vpop.f32.mrb[11].mxu1 }
 0x5df   : > { %919 = vrot.lane.b32.xlu0 %v835_v1, %s1770_s19  ;;  %1595 = vmatpush3.msra.mxu0 %v835_v1 }
 0x5e0   : > { %1597 = vmatmul.mubr.msk.f32.vlgmr.msra.gmra.mrb[8].mxu0 %vm346_vm5, %v1877_v17  ;;  %1662 = vmatprep.subr.bf16.mxu0 %v1771_v23 }
 0x5e1   : > { %1599 = vmatprep.mubr.msk.f32.mxu0 %vm1767_vm0, %v1766_v0 }
 0x5e4   : > { %1600 = vmatmul.mubr.msk.f32.gmra.mrb[10].mxu0 %vm346_vm5, %v1884_v19 }
 0x5e5   : > { %1602 = vmatprep.mubr.msk.f32.mxu0 %vm1767_vm0, %v1766_v0 }
 0x5e8   : > { %1603 = vmatmul.mubr.msk.f32.gmra.mrb[12].mxu0 %vm346_vm5, %v1892_v20 }
 0x5e9   : > { %1622 = vmatprep.mubr.msk.f32.mxu0 %vm1767_vm0, %v1766_v0 }
 0x651   : > { %v920_v3 = vpop.permute.xlu0 %919 }
 0x652   : > { %1606 = vmatpush3.msra.mxu1 %v920_v3 }
 0x653   : > { %1608 = vmatmul.mubr.msk.f32.vlgmr.msra.gmra.mrb[12].mxu1 %vm346_vm5, %v1908_v22  ;;  %1665 = vmatprep.subr.bf16.mxu1 %v1771_v23 }
 0x654   : > { %1610 = vmatprep.mubr.msk.f32.mxu1 %vm1767_vm0, %v1766_v0 }
 0x657   : > { %1611 = vmatmul.mubr.msk.f32.gmra.mrb[14].mxu1 %vm346_vm5, %v1920_v25 }
 0x658   : > { %1613 = vmatprep.mubr.msk.f32.mxu1 %vm1767_vm0, %v1766_v0 }
 0x65b   : > { %1614 = vmatmul.mubr.msk.f32.gmra.mrb[16].mxu1 %vm346_vm5, %v1932_v26 }
 0x65c   : > { %1631 = vmatprep.mubr.msk.f32.mxu1 %vm1767_vm0, %v1766_v0 }
 0x6b3   : > { %v2024_v17 = vpop.f32.mrb[8].mxu0 }
 0x6b4   : > { %v1598_v19 = vpop.f32.mrb[9].mxu0 }
 0x6b7   : > { %v2026_v20 = vpop.f32.mrb[10].mxu0 }
 0x6b8   : > { %v1601_v4 = vpop.f32.mrb[11].mxu0 }
 0x6bb   : > { %v2028_v5 = vpop.f32.mrb[12].mxu0 }
 0x6bc   : > { %v1604_v6 = vpop.f32.mrb[13].mxu0 }
 0x726   : > { %v988_v7 = vpop.f32.mrb[12].mxu1 }
 0x727   : > { %v1002_v9 = vadd.f32 %v988_v7, %v2024_v17  ;;  %v1609_v12 = vpop.f32.mrb[13].mxu1 }
 0x729   : > { %vm1005_vm1 = vcmp.gt.f32.partialorder %v1002_v9, 0.0  ;;  %v1008_v13 = vmul.f32 0.2, %v1002_v9 }
 0x72a   : > { %v993_v15 = vpop.f32.mrb[14].mxu1 }
 0x72b   : > { %v1003_v16 = vadd.f32 %v993_v15, %v2026_v20  ;;  %v1612_v18 = vpop.f32.mrb[15].mxu1  ;;  %v1011_v28 = vsel %vm1005_vm1, %v1002_v9, %v1008_v13 }
 0x72c   : > { %v1018_v30 = vmul.f32 %v1483_v14, %v1011_v28  ;;  %v1486_v18 = vld [vmem:[#allocation2 + $0x50] ss:$0 sm:$0xff] }
 0x72d   : > { %vm1006_vm2 = vcmp.gt.f32.partialorder %v1003_v16, 0.0  ;;  %v1009_v32 = vmul.f32 0.2, %v1003_v16 }
 0x72e   : > { %v998_v33 = vpop.f32.mrb[16].mxu1  ;;  %v1021_v34 = vsel %vm548_vm11, %v1018_v30, 0.0  ;;  %v1296_v30 = vld [vmem:[#allocation2 + $0x58] sm:$0xff] }
 0x72f   : > { %v1004_v35 = vadd.f32 %v998_v33, %v2028_v5  ;;  %1022 = vadd.xlane.f32.xlu1 %v1021_v34  ;;  %v1615_v36 = vpop.f32.mrb[17].mxu1  ;;  %v1012_v37 = vsel %vm1006_vm2, %v1003_v16, %v1009_v32  ;;  %v1297_v32 = vld [vmem:[#allocation2 + $0x60] sm:$0xff] }
 0x730   : > { %v1019_v38 = vmul.f32 %v1483_v14, %v1012_v37  ;;  %v1669_v36 = vpack.c.bf16 %v1297_v32, %v1296_v30  ;;  %v1298_v37 = vld [vmem:[#allocation2 + $0x68] sm:$0xff] }
 0x731   : > { %vm1007_vm4 = vcmp.gt.f32.partialorder %v1004_v35, 0.0  ;;  %v1010_v39 = vmul.f32 0.2, %v1004_v35 }
 0x732   : > { %v1024_v40 = vsel %vm548_vm11, %v1019_v38, 0.0  ;;  %v1299_v38 = vld [vmem:[#allocation2 + $0x70] sm:$0xff] }
 0x733   : > { %1025 = vadd.xlane.f32.xlu0 %v1024_v40  ;;  %v1013_v41 = vsel %vm1007_vm4, %v1004_v35, %v1010_v39  ;;  %v1222_v35 = vld [vmem:[#allocation2 + $0x80] sm:$0xf] }
 0x734   : > { %v1020_v42 = vmul.f32 %v1483_v14, %v1013_v41  ;;  %v1488_v41 = vld [vmem:[#allocation2 + $0x78] ss:$0 sm:$0xff] }
 0x736   : > { %v1027_v43 = vsel %vm548_vm11, %v1020_v42, 0.0 }
 0x737   : > { %1028 = vadd.xlane.f32.xlu1 %v1027_v43 }
 0x7bc   : > { %v1023_v44 = vpop.xlane.xlu1 %1022 }
 0x7bd   : > { %v1030_v46 = vsel %vm240_vm8, %v1023_v44, -1e+30 }
 0x7be   : > { %v1033_v27 = vsel %vm346_vm5, %v1030_v46, -inf }
 0x7c0   : > { %v1026_v45 = vpop.xlane.xlu0 %1025 }
 0x7c1   : > { %v1031_v47 = vsel %vm241_vm3, %v1026_v45, -1e+30  ;;  %vm1378_vm3 = vcmask 257024  }
 0x7c2   : > { %v1034_v48 = vsel %vm346_vm5, %v1031_v47, -inf }
 0x7c3   : > { %v1036_v31 = vmax.f32 %v1033_v27, %v1034_v48 }
 0x7c4   : > { %v1029_v29 = vpop.xlane.xlu1 %1028 }
 0x7c5   : > { %v1032_v49 = vsel %vm242_vm9, %v1029_v29, -1e+30 }
 0x7c6   : > { %v1035_v50 = vsel %vm346_vm5, %v1032_v49, -inf }
 0x7c7   : > { %v1037_v51 = vmax.f32 %v1036_v31, %v1035_v50 }
 0x7c9   : > { %v1038_v52 = vrot.slane %v1037_v51, 4 }
 0x7cb   : > { %v1039_v21 = vmax.f32 %v1037_v51, %v1038_v52 }
 0x7cd   : > { %v1040_v53 = vrot.slane %v1039_v21, 2 }
 0x7cf   : > { %v1041_v54 = vmax.f32 %v1039_v21, %v1040_v53 }
 0x7d1   : > { %v1042_v55 = vrot.slane %v1041_v54, 1 }
 0x7d3   : > { %v1043_v11 = vmax.f32 %v1041_v54, %v1042_v55 }
 0x7d5   : > { %v1045_v56 = vmul.f32 %v1920_v25, %v1043_v11  ;;  %v1044_v57 = vmul.f32 %v1908_v22, %v1043_v11  ;;  %v1046_v10 = vmul.f32 %v1932_v26, %v1043_v11 }
 0x7d7   : > { %v1050_v58 = vsel %vm346_vm5, %v1045_v56, 0.0  ;;  %v1047_v59 = vsel %vm346_vm5, %v1044_v57, 0.0  ;;  %v1053_v24 = vsel %vm346_vm5, %v1046_v10, 0.0 }
 0x7d8   : > { %1051 = vadd.xlane.f32.xlu1 %v1050_v58  ;;  %1048 = vadd.xlane.f32.xlu0 %v1047_v59 }
 0x7dc   : > { %1054 = vadd.xlane.f32.xlu0 %v1053_v24 }
 0x865   : > { %v1052_v60 = vpop.xlane.xlu1 %1051  ;;  %v1049_v61 = vpop.xlane.xlu0 %1048 }
 0x866   : > { %v1057_v62 = vsub.f32 %v1026_v45, %v1052_v60  ;;  %v1056_v63 = vsub.f32 %v1023_v44, %v1049_v61 }
 0x868   : > { %v1061_v1 = vmul.f32 1.442695, %v1057_v62  ;;  %v1059_v2 = vmul.f32 1.442695, %v1056_v63 }
 0x869   : > { %v1055_v25 = vpop.xlane.xlu0 %1054 }
 0x86a   : > { %1715 = vpow2.f32 %v1061_v1  ;;  %v1058_v22 = vsub.f32 %v1029_v29, %v1055_v25 }
 0x86b   : > { %1717 = vpow2.f32 %v1059_v2 }
 0x86c   : > { %v1063_v3 = vmul.f32 1.442695, %v1058_v22 }
 0x86e   : > { %1719 = vpow2.f32 %v1063_v3 }
 0x874   : > { %v1716_v19 = vpop.eup %1715 }
 0x875   : > { %v1718_v4 = vpop.eup %1717  ;;  %v1136_v26 = vmul.f32 %v1716_v19, %v2026_v20 }
 0x876   : > { %v1663_v6 = vpack.c.bf16 %v1716_v19, %v1718_v4  ;;  %v1135_v7 = vmul.f32 %v1718_v4, %v2024_v17 }
 0x878   : > { %1664 = vmatpush3.bf16.msra.mxu0 %v1663_v6  ;;  %v1666_v9 = vpack.c.bf16 %v1136_v26, %v1135_v7  ;;  %v1720_v12 = vpop.eup %1719 }
 0x879   : > { %1620 = vmatprep.subr.mxu0 %v1766_v0  ;;  %v1137_v13 = vmul.f32 %v1720_v12, %v2028_v5 }
 0x87a   : > { %1667 = vmatpush3.bf16.msra.mxu1 %v1666_v9 }
 0x87b   : > { %1629 = vmatprep.subr.mxu1 %v1766_v0 }
 0x87c   : > { %1621 = vmatpush3.msra.mxu0 %v1720_v12 }
 0x87d   : > { %1623 = vmatmul.mubr.msk.f32.vlgmr.msra.gmra.mrb[14].mxu0 %vm593_vm15, %v1978_v8  ;;  %1634 = vmatprep.subr.mxu0 %v1766_v0 }
 0x87e   : > { %1630 = vmatpush3.msra.mxu1 %v1137_v13  ;;  %1636 = vmatprep.mubr.msk.f32.mxu0 %vm1767_vm0, %v1766_v0 }
 0x87f   : > { %1632 = vmatmul.mubr.msk.f32.vlgmr.msra.gmra.mrb[18].mxu1 %vm593_vm15, %v1978_v8  ;;  %v1672_v8 = vpack.c.bf16 %v1299_v38, %v1298_v37 }
 0x950   : > { %v1131_v17 = vpop.f32.mrb[14].mxu0 }
 0x951   : > { %1721 = vrcp.f32 %v1131_v17  ;;  %v1624_v20 = vpop.f32.mrb[15].mxu0 }
 0x952   : > { %v1204_v14 = vpop.f32.mrb[18].mxu1 }
 0x953   : > { %v1633_v16 = vpop.f32.mrb[19].mxu1 }
 0x95b   : > { %v1722_v15 = vpop.eup %1721 }
 0x95c   : > { %1212 = vperm.xlu1 %1705, %v1722_v15  }
 0x9db   : > { %v1213_v5 = vpop.permute.xlu1 %1212 }
 0x9dc   : > { %v1215_v28 = vmul.f32 %v1213_v5, %v1204_v14 }
 0x9de   : > { %v1220_v33 = vadd.f32 %v1486_v18, %v1215_v28 }
 0x9e0   : > { %v1221_v34 = vmax.f32 %v1220_v33, 0.0 }
 0x9e2   : > { %1635 = vmatpush3.msra.mxu0 %v1221_v34 }
 0x9e3   : > { %1637 = vmatmul.mubr.msk.f32.vlgmr.msra.gmra.mrb[16].mxu0 %vm346_vm5, %v1222_v35  ;;  %1668 = vmatprep.subr.bf16.mxu0 %v1771_v23 }
 0x9e4   : > { %1670 = vmatpush3.bf16.msra.mxu0 %v1669_v36  ;;  %1647 = vmatprep.mubr.msk.f32.mxu0 %vm1767_vm0, %v1766_v0 }
 0x9e5   : > { %1671 = vmatprep.subr.bf16.mxu0 %v1771_v23 }
 0x9e8   : > { %1673 = vmatpush3.bf16.msra.mxu0 %v1672_v8 }
 0xab6   : > { %v1292_v39 = vpop.f32.mrb[16].mxu0 }
 0xab7   : > { %v1638_v40 = vpop.f32.mrb[17].mxu0  ;;  %1648 = vmatmul.mubr.msk.f32.vlgmr.msra.gmra.mrb[18].mxu0 %vm548_vm11, %v1292_v39 }
 0xb8a   : > { %v1374_v42 = vpop.f32.mrb[18].mxu0 }
 0xb8b   : > { %v1375_v43 = vadd.f32 %v1488_v41, %v1374_v42  ;;  %v1649_v44 = vpop.f32.mrb[19].mxu0 }
 0xb8d   : > { %1379 = vst.msk [vmem:[%s207_s25] sm:$0xf] %vm1378_vm3, %v1375_v43 }
 0xb8e PF: > { %s15_s15 = sadd.s32 1, %s1761_s15  }
 0xb8f   : > { %p12_p3 = scmp.ge.s32.totalorder %s15_s15, 4  }
 0xb91   :  { %14 = sbr.rel (!%p12_p3) target bundleno = 1 (0x1), region = 71 }
 0xb98   :  { %1399 = vsyncpa [#allocation3], 1 }
 0xb99   :  { %1401 = vsyncpa [#allocation3 + $0x1], 1 }

</bundles_post_ra>
